<compile_context>
chip_gen: v7x
topology: tpu7x:2x2x1
jax: 0.10.0
libtpu: 0.0.40
codegen_flags: <defaults>
</compile_context>

<pallas_src>
import jax
import jax.numpy as jnp
from jax.experimental import pallas as pl
from jax.experimental.pallas import tpu as pltpu


def _make_wbce_tile_kernel(tile_rows: int, n_rows: int, threshold: float):
    needs_row_mask = (n_rows % tile_rows) != 0

    def kernel(logits_ref, targets_ref, base_ref, wsum_ref, cnt_ref):
        # Cast after the (possibly bf16) load; all math stays f32 (v5e VPU/EUP have no bf16).
        x = logits_ref[...].astype(jnp.float32)   # [TILE_N, TILE_C]
        t = targets_ref[...].astype(jnp.float32)  # [TILE_N, TILE_C]

        # Numerically stable softplus(-x): exactly 1 exp + 1 log1p per element.
        sp = jnp.maximum(-x, 0.0) + jnp.log1p(jnp.exp(-jnp.abs(x)))

        base = (1.0 - t) * x + sp          # pos_weight-independent part of the loss
        wterm = t * sp                     # multiplied by (pos_weight - 1) in the wrapper
        cnt = (t > threshold).astype(jnp.float32)

        if needs_row_mask:
            # Last row tile may overhang the batch; drop padded rows from all partials.
            row0 = pl.program_id(0) * tile_rows
            rows = row0 + jax.lax.broadcasted_iota(jnp.int32, (tile_rows, 1), 0)
            valid = rows < n_rows
            base = jnp.where(valid, base, 0.0)
            wterm = jnp.where(valid, wterm, 0.0)
            cnt = jnp.where(valid, cnt, 0.0)

        # Row-only (sublane) reduce -> lane-dense [1, TILE_C] partials per tile.
        base_ref[0] = jnp.sum(base, axis=0, keepdims=True)
        wsum_ref[0] = jnp.sum(wterm, axis=0, keepdims=True)
        cnt_ref[0] = jnp.sum(cnt, axis=0, keepdims=True)

    return kernel


def wbce_with_logits(logits, targets, threshold: float = 0.5, max_clamp: float = 200.0,
                     tile_rows: int | None = None, tile_cols: int | None = None):
    """Weighted BCE-with-logits, reduction='mean' (matches the torch module).

    Pass logits/targets in their native storage dtype (bf16 / narrow targets welcome);
    do NOT pre-cast to f32 in the caller — the kernel upcasts inside VMEM.
    """
    assert logits.shape == targets.shape and logits.ndim == 2
    n, c = logits.shape

    isz_l = jnp.dtype(logits.dtype).itemsize
    isz_t = jnp.dtype(targets.dtype).itemsize
    isz_min = min(isz_l, isz_t)
    isz_max = max(isz_l, isz_t)
    sublane = 8 * max(1, 4 // isz_min)   # 8 for f32 inputs, 16 for bf16

    # --- generation-aware budgets: VMEM capacity + TensorCore count (best effort) ---
    vmem_cap = 64 << 20
    num_cores = 1
    try:
        info = pltpu.get_tpu_info()
        vmem_cap = int(getattr(info, "vmem_capacity_bytes", vmem_cap))
        for attr in ("num_cores", "num_tensorcores", "tensorcore_count", "cores_per_chip"):
            v = getattr(info, attr, None)
            if v is None:
                continue
            try:
                v = int(v)
            except (TypeError, ValueError):
                continue
            if v > 0:
                num_cores = max(num_cores, v)
    except Exception:
        pass
    # ~4 MiB/input buffer on 64 MiB-VMEM chips (v7x), ~8 MiB on 128 MiB chips (v5e/v6e).
    per_buf_budget = (8 << 20) if vmem_cap >= (128 << 20) else (4 << 20)

    # --- column tiling only if a sublane-tall full-width block would bust the budget ---
    if tile_cols is None:
        if c <= 128 or sublane * c * isz_max <= per_buf_budget:
            tile_c = c
        else:
            tile_c = max(128, (per_buf_budget // (sublane * isz_max)) // 128 * 128)
            if tile_c >= c:
                tile_c = c
    else:
        tile_c = tile_cols
    n_col_tiles = pl.cdiv(c, tile_c)

    # --- row tile: grow to the byte budget (no artificial 512-row cap) ---
    if tile_rows is None:
        tile_rows = per_buf_budget // max(1, tile_c * isz_max)
    tile_rows = max(sublane, (tile_rows // sublane) * sublane)
    n_rounded = ((n + sublane - 1) // sublane) * sublane
    tile_rows = min(tile_rows, max(sublane, n_rounded))
    n_row_tiles = pl.cdiv(n, tile_rows)

    kernel = _make_wbce_tile_kernel(tile_rows, n, threshold)

    # --- vmem limit sized from the actual double-buffered working set ---
    step_bytes = tile_rows * tile_c * (isz_l + isz_t) + 3 * tile_c * 4
    vmem_limit = int(min(max(2 * step_bytes + (4 << 20), 16 << 20),
                         max(32 << 20, (3 * vmem_cap) // 4)))

    cost = pl.CostEstimate(
        flops=8 * n * c,
        transcendentals=2 * n * c,
        bytes_accessed=int(n * c * (isz_l + isz_t) + 3 * n_row_tiles * c * 4),
    )

    in_spec = pl.BlockSpec((tile_rows, tile_c), lambda i, j: (i, j))
    out_spec = pl.BlockSpec((1, 1, tile_c), lambda i, j: (i, 0, j))
    out_shape = tuple(jax.ShapeDtypeStruct((n_row_tiles, 1, c), jnp.float32)
                      for _ in range(3))

    def _call(dim_sems):
        return pl.pallas_call(
            kernel,
            out_shape=out_shape,
            grid=(n_row_tiles, n_col_tiles),
            in_specs=[in_spec, in_spec],
            out_specs=(out_spec, out_spec, out_spec),
            compiler_params=pltpu.CompilerParams(
                dimension_semantics=dim_sems,
                vmem_limit_bytes=vmem_limit,
            ),
            cost_estimate=cost,
        )(logits, targets)

    # Only CORE_PARALLEL actually shards a grid axis across v7x's two TensorCores;
    # "parallel" is a no-op for that.  Try it when the chip reports >1 TC, fall back
    # to the known-good plain-parallel lowering on any failure (v5e/v6e path).
    core_parallel = getattr(pltpu, "CORE_PARALLEL", None)
    candidates = []
    if core_parallel is not None and num_cores > 1 and n_row_tiles >= num_cores:
        candidates.append((core_parallel, "parallel"))
    candidates.append(("parallel", "parallel"))

    base_p = wsum_p = cnt_p = None
    for idx, sems in enumerate(candidates):
        try:
            base_p, wsum_p, cnt_p = _call(sems)
            break
        except Exception:
            if idx == len(candidates) - 1:
                raise

    # --- tiny combine on [tiles, C] partials: pos_weight, weighted correction, mean ---
    base_sum = jnp.sum(base_p)
    wsum_col = jnp.sum(wsum_p, axis=(0, 1))                         # [C]
    cnt_col = jnp.sum(cnt_p, axis=(0, 1))                           # [C]
    # zero positives -> n/0 = inf -> clipped to max_clamp (matches torch.clamp semantics)
    pos_weight = jnp.clip(jnp.float32(n) / cnt_col, 1.0, max_clamp)
    total = base_sum + jnp.sum((pos_weight - 1.0) * wsum_col)
    return total / jnp.float32(n * c)


def wbce_reference(logits, targets, threshold=0.5, max_clamp=200.0):
    # pure-JAX reference matching the torch module (for sanity checking)
    n = logits.shape[0]
    pos_count = jnp.sum((targets > threshold).astype(jnp.float32), axis=0)
    pos_weight = jnp.clip(n / pos_count, 1.0, max_clamp)
    log_weight = 1.0 + (pos_weight - 1.0) * targets
    sp = jnp.maximum(-logits, 0.0) + jnp.log1p(jnp.exp(-jnp.abs(logits)))
    loss = (1.0 - targets) * logits + log_weight * sp
    return jnp.mean(loss)


if __name__ == "__main__":
    key = jax.random.PRNGKey(0)
    k1, k2, k3, k4 = jax.random.split(key, 4)

    # Case 1: f32, evenly-divided batch, forced to 2 row tiles to exercise the grid
    # and the cross-tile combine of the fused pos_weight statistics.
    N, C = 16, 128
    logits = jax.random.normal(k1, (N, C), dtype=jnp.float32)
    targets = (jax.random.uniform(k2, (N, C)) > 0.7).astype(jnp.float32)  # binary labels
    ref = wbce_reference(logits, targets)
    out = jax.block_until_ready(wbce_with_logits(logits, targets, tile_rows=8))
    assert jnp.allclose(out, ref, rtol=1e-5, atol=1e-5), (out, ref)

    # Case 2: ragged batch (padded-row mask path) + a column with zero positives
    # (exercises the n/0 -> inf -> clamp(max_clamp) path).
    N2 = 20
    logits2 = jax.random.normal(k3, (N2, C), dtype=jnp.float32)
    targets2 = (jax.random.uniform(k4, (N2, C)) > 0.7).astype(jnp.float32)
    targets2 = targets2.at[:, 0].set(0.0)
    ref2 = wbce_reference(logits2, targets2)
    out2 = jax.block_until_ready(wbce_with_logits(logits2, targets2, tile_rows=8))
    assert jnp.allclose(out2, ref2, rtol=1e-5, atol=1e-5), (out2, ref2)

    # Case 3: bf16 I/O (halves HBM traffic; compute stays f32 inside the kernel).
    out3 = jax.block_until_ready(
        wbce_with_logits(logits.astype(jnp.bfloat16), targets.astype(jnp.bfloat16)))
    assert jnp.allclose(out3, ref, rtol=2e-2, atol=2e-2), (out3, ref)

    print("KERNEL_OK")
</pallas_src>

<mosaic_0001>
module attributes {stable_mosaic.version = 11 : i64} {
  func.func @kernel(%arg0: i32, %arg1: i32, %arg2: memref<8x128xf32, #tpu.memory_space<vmem>>, %arg3: memref<8x128xf32, #tpu.memory_space<vmem>>, %arg4: memref<1x1x128xf32, #tpu.memory_space<vmem>>, %arg5: memref<1x1x128xf32, #tpu.memory_space<vmem>>, %arg6: memref<1x1x128xf32, #tpu.memory_space<vmem>>) attributes {dimension_semantics = [#tpu.dimension_semantics<parallel>, #tpu.dimension_semantics<parallel>], iteration_bounds = array<i64: 2, 1>, scalar_prefetch = 0 : i64, scratch_operands = 0 : i64, tpu.core_type = #tpu.core_type<tc>, window_params = [{transform_indices = @transform_0, window_bounds = array<i64: 8, 128>}, {transform_indices = @transform_1, window_bounds = array<i64: 8, 128>}, {transform_indices = @transform_2, window_bounds = array<i64: 1, 1, 128>}, {transform_indices = @transform_3, window_bounds = array<i64: 1, 1, 128>}, {transform_indices = @transform_4, window_bounds = array<i64: 1, 1, 128>}]} {
    %c0 = arith.constant 0 : index
    %c0_0 = arith.constant 0 : index
    %0 = vector.load %arg2[%c0, %c0_0] : memref<8x128xf32, #tpu.memory_space<vmem>>, vector<8x128xf32>
    %c0_1 = arith.constant 0 : index
    %c0_2 = arith.constant 0 : index
    %1 = vector.load %arg3[%c0_1, %c0_2] : memref<8x128xf32, #tpu.memory_space<vmem>>, vector<8x128xf32>
    %cst = arith.constant 0.000000e+00 : f32
    %2 = vector.broadcast %cst : f32 to vector<8x128xf32>
    %3 = arith.subf %2, %0 : vector<8x128xf32>
    %cst_3 = arith.constant 0.000000e+00 : f32
    %4 = vector.broadcast %cst_3 : f32 to vector<8x128xf32>
    %5 = arith.maximumf %3, %4 : vector<8x128xf32>
    %6 = math.absf %0 : vector<8x128xf32>
    %cst_4 = arith.constant 0.000000e+00 : f32
    %7 = vector.broadcast %cst_4 : f32 to vector<8x128xf32>
    %8 = arith.subf %7, %6 : vector<8x128xf32>
    %9 = math.exp %8 : vector<8x128xf32>
    %10 = math.log1p %9 : vector<8x128xf32>
    %11 = arith.addf %5, %10 : vector<8x128xf32>
    %cst_5 = arith.constant 1.000000e+00 : f32
    %12 = vector.broadcast %cst_5 : f32 to vector<8x128xf32>
    %13 = arith.subf %12, %1 : vector<8x128xf32>
    %14 = arith.mulf %13, %0 : vector<8x128xf32>
    %15 = arith.addf %14, %11 : vector<8x128xf32>
    %16 = arith.mulf %1, %11 : vector<8x128xf32>
    %cst_6 = arith.constant 5.000000e-01 : f32
    %17 = vector.broadcast %cst_6 : f32 to vector<8x128xf32>
    %18 = arith.cmpf ogt, %1, %17 : vector<8x128xf32>
    %19 = arith.extui %18 : vector<8x128xi1> to vector<8x128xi32>
    %20 = arith.sitofp %19 : vector<8x128xi32> to vector<8x128xf32>
    %cst_7 = arith.constant dense<0.000000e+00> : vector<128xf32>
    %21 = vector.multi_reduction <add>, %15, %cst_7 [0] : vector<8x128xf32> to vector<128xf32>
    %22 = vector.shape_cast %21 : vector<128xf32> to vector<1x128xf32>
    %c0_8 = arith.constant 0 : index
    %c0_9 = arith.constant 0 : index
    %c0_10 = arith.constant 0 : index
    %23 = vector.load %arg4[%c0_8, %c0_9, %c0_10] : memref<1x1x128xf32, #tpu.memory_space<vmem>>, vector<1x1x128xf32>
    %24 = vector.shape_cast %23 : vector<1x1x128xf32> to vector<1x128xf32>
    %25 = vector.shape_cast %22 : vector<1x128xf32> to vector<1x1x128xf32>
    tpu.vector_store %arg4[%c0_8, %c0_9, %c0_10], %25 {strides = array<i32>} : memref<1x1x128xf32, #tpu.memory_space<vmem>>, vector<1x1x128xf32>,
    %cst_11 = arith.constant dense<0.000000e+00> : vector<128xf32>
    %26 = vector.multi_reduction <add>, %16, %cst_11 [0] : vector<8x128xf32> to vector<128xf32>
    %27 = vector.shape_cast %26 : vector<128xf32> to vector<1x128xf32>
    %c0_12 = arith.constant 0 : index
    %c0_13 = arith.constant 0 : index
    %c0_14 = arith.constant 0 : index
    %28 = vector.load %arg5[%c0_12, %c0_13, %c0_14] : memref<1x1x128xf32, #tpu.memory_space<vmem>>, vector<1x1x128xf32>
    %29 = vector.shape_cast %28 : vector<1x1x128xf32> to vector<1x128xf32>
    %30 = vector.shape_cast %27 : vector<1x128xf32> to vector<1x1x128xf32>
    tpu.vector_store %arg5[%c0_12, %c0_13, %c0_14], %30 {strides = array<i32>} : memref<1x1x128xf32, #tpu.memory_space<vmem>>, vector<1x1x128xf32>,
    %cst_15 = arith.constant dense<0.000000e+00> : vector<128xf32>
    %31 = vector.multi_reduction <add>, %20, %cst_15 [0] : vector<8x128xf32> to vector<128xf32>
    %32 = vector.shape_cast %31 : vector<128xf32> to vector<1x128xf32>
    %c0_16 = arith.constant 0 : index
    %c0_17 = arith.constant 0 : index
    %c0_18 = arith.constant 0 : index
    %33 = vector.load %arg6[%c0_16, %c0_17, %c0_18] : memref<1x1x128xf32, #tpu.memory_space<vmem>>, vector<1x1x128xf32>
    %34 = vector.shape_cast %33 : vector<1x1x128xf32> to vector<1x128xf32>
    %35 = vector.shape_cast %32 : vector<1x128xf32> to vector<1x1x128xf32>
    tpu.vector_store %arg6[%c0_16, %c0_17, %c0_18], %35 {strides = array<i32>} : memref<1x1x128xf32, #tpu.memory_space<vmem>>, vector<1x1x128xf32>,
    return
  }
  func.func @transform_0(%arg0: i32, %arg1: i32) -> (i32, i32) {
    %c0_i32 = arith.constant 0 : i32
    return %arg0, %arg1 : i32, i32
  }
  func.func @transform_1(%arg0: i32, %arg1: i32) -> (i32, i32) {
    %c0_i32 = arith.constant 0 : i32
    return %arg0, %arg1 : i32, i32
  }
  func.func @transform_2(%arg0: i32, %arg1: i32) -> (i32, i32, i32) {
    %c0_i32 = arith.constant 0 : i32
    %c0_i32_0 = arith.constant 0 : i32
    return %arg0, %c0_i32, %arg1 : i32, i32, i32
  }
  func.func @transform_3(%arg0: i32, %arg1: i32) -> (i32, i32, i32) {
    %c0_i32 = arith.constant 0 : i32
    %c0_i32_0 = arith.constant 0 : i32
    return %arg0, %c0_i32, %arg1 : i32, i32, i32
  }
  func.func @transform_4(%arg0: i32, %arg1: i32) -> (i32, i32, i32) {
    %c0_i32 = arith.constant 0 : i32
    %c0_i32_0 = arith.constant 0 : i32
    return %arg0, %c0_i32, %arg1 : i32, i32, i32
  }
}

</mosaic_0001>

<bundles_post_ra>
// kernel: tpu_custom_call.1
= control target key start
LH: loop header
LB: loop body
LE: loop exit
PB: predicated region body
PF: predicated region fallthrough
CT: control target
= control target key end

     0   :  { %s1174_s0 = inlined_call_operand.hbm [shape: f32[16,128], index: 0, kind: input, shape index: {}]   ;;  %s1175_s1 = inlined_call_operand.hbm [shape: f32[16,128], index: 1, kind: input, shape index: {}]   ;;  %s1176_s2 = inlined_call_operand.hbm [shape: f32[2,1,128], index: 2, kind: output, shape index: {0}]   ;;  %s1177_s3 = inlined_call_operand.hbm [shape: f32[2,1,128], index: 3, kind: output, shape index: {1}]   ;;  %s1178_s4 = inlined_call_operand.hbm [shape: f32[2,1,128], index: 4, kind: output, shape index: {2}]  }
   0x1   :  { %1182 = sst [smem:[#allocation15_spill]] %s1174_s0 }
   0x2   :  { %10 = vsyncpa [#allocation3], 0 }
   0x3   :  { %12 = vsyncpa [#allocation3 + $0x1], 0 }
   0x4   :  { %13 = vsyncpa [#allocation6], 0 }
   0x5   :  { %15 = vsyncpa [#allocation6 + $0x1], 0 }
   0x6   :  { %16 = vsyncpa [#allocation4], 0 }
   0x7   :  { %18 = vsyncpa [#allocation4 + $0x1], 0 }
   0x8   :  { %19 = vsyncpa [#allocation9], 0 }
   0x9   :  { %21 = vsyncpa [#allocation9 + $0x1], 0  ;;  %s878_s15 = smov 0   ;;  %s880_s16 = smov 0  }
   0xa   :  { %s882_s17 = smov 0   ;;  %s884_s18 = smov 0  }
   0xb   :  { %s886_s19 = smov 0   ;;  %s888_s20 = smov 0  }
   0xc LB: > { %s909_s21 = sadd.s32 4294967295, %s845_s20   ;;  %s1179_s22 = sadd.s32 4294967294, %s845_s20   ;;  %s845_s20 = sphi %s888_s20, %s27_s20   ;;  %s841_s19 = sphi %s886_s19, %s1202_s19   ;;  %s837_s18 = sphi %s884_s18, %s1201_s18   ;;  %s833_s17 = sphi %s882_s17, %s1200_s17   ;;  %s829_s16 = sphi %s880_s16, %s1199_s16   ;;  %s825_s15 = sphi %s878_s15, %s1198_s15  }
   0xd   : > { %s39_s23 = sadd.s32 1, %s841_s19  ;;  %s48_s24 = sadd.s32 1, %s833_s17 }
   0xe   : > { %p41_p0 = scmp.ge.s32.totalorder %s39_s23, 2  ;;  %p55_p1 = scmp.ne.s32.totalorder %s833_s17, %s829_s16 }
   0xf   : > { %p56_p2 = scmp.eq.s32.totalorder %s845_s20, 0  ;;  %p61_p3 = scmp.ne.s32.totalorder %s829_s16, %s825_s15 }
  0x10   : > { %s1204_s23 = smov (%p41_p0, %s39_s23), 0  ;;  %p62_p5 = scmp.eq.s32.totalorder %s909_s21, 0 }
  0x11   : > { %p921_p4 = por %p56_p2, %p55_p1  ;;  %s43_s26 = ssub.s32 %s841_s19, %s1204_s23 }
  0x12   : > { %p115_p6 = scmp.eq.s32.totalorder %s909_s21, 1  ;;  %p46_p7 = scmp.eq.s32.totalorder %s43_s26, 0 }
  0x13   : > { %p929_p8 = por %p62_p5, %p61_p3  ;;  %p121_p10 = scmp.eq.s32.totalorder %s1179_s22, 1 }
  0x14   : > { %p933_p9 = por %p115_p6, %p55_p1  ;;  %p584_p13 = scmp.lt.s32.totalorder %s845_s20, 2 }
  0x15   : > { %s1184_s27 = scalar_select %p929_p8, 1, 0 }
  0x16   : > { %s1185_s28 = scalar_select %p933_p9, 1, 0 }
  0x17   : > { %s940_s29 = scalar_select %p46_p7, %s833_s17, %s48_s24  }
  0x18   : > { %p942_p11 = por %p121_p10, %p61_p3  ;;  %s949_s5 = sand.u32 1, %s833_s17  }
  0x19   : > { %s544_s6 = sshll.u32 %s949_s5, 3  ;;  %s545_s7 = sshll.u32 %s841_s19, 7 }
  0x1a   : > { %s1186_s30 = scalar_select %p942_p11, 1, 0 }
  0x1b   : > { %s1187_s0 = sld [smem:[#allocation15_spill]]  ;;  %s201_s11 = scalar_lea.vmem [#allocation2], %s544_s6 }
  0x1c   : > { %s209_s12 = sshll.u32 %s201_s11, 4  ;;  %p966_p0 = pnand %p584_p13, %p921_p4  ;;  %s962_s12 = int_to_ptr.vmem [resolvable:$true] %s209_s12 }
  0x1d   : > { %s198_s14 = scalar_lea.sflag [#allocation3], %s949_s5 }
  0x1e   : > { %p641_p5 = pneg %p966_p0 }
  0x21   : > { %s958_s10 = scalar_lea.hbm %s1187_s0, %s545_s7  ;;  %s644_s25 = scalar_lea.hbm %s1187_s0, 256 }
  0x22   : > { %s639_s24 = scalar_lea.hbm %s958_s10, 128  ;;  %p645_p4 = scmp.lt.u32.totalorder %s958_s10, %s1187_s0 }
  0x23   : > { %p640_p3 = scmp.ne.s32.totalorder %s958_s10, %s639_s24  ;;  %p646_p10 = scmp.lt.u32.totalorder %s644_s25, %s639_s24 }
  0x24   : > { %p648_p12 = scmp.lt.u32.totalorder %s639_s24, %s958_s10 }
  0x25   : > { %p642_p6 = pnand %p641_p5, %p640_p3  ;;  %p647_p13 = por %p646_p10, %p645_p4 }
  0x27   : > { %p643_p7 = pneg %p642_p6  ;;  %p649_p1 = por %p648_p12, %p647_p13 }
  0x29   : > { %p650_p2 = pnand %p649_p1, %p643_p7 }
  0x2b   : > { %653 = shalt.err (!%p650_p2)
}
  0x2c   : > { %s654_s22 = scalar_lea.vmem %s962_s12, 128  ;;  %s847_s26 = smov [#allocation2]  }
  0x2d   : > { %p655_p3 = scmp.ne.s32.totalorder %s962_s12, %s654_s22  ;;  %s659_s8 = sshll.u32 %s847_s26, 4  ;;  %s660_s8 = int_to_ptr.vmem [resolvable:$false] %s659_s8 }
  0x2e   : > { %s661_s9 = scalar_lea.vmem %s660_s8, 256  ;;  %p662_p9 = scmp.lt.s32.totalorder %s962_s12, %s660_s8 }
  0x2f   : > { %p657_p6 = pnand %p655_p3, %p641_p5  ;;  %p663_p4 = scmp.lt.s32.totalorder %s661_s9, %s654_s22 }
  0x31   : > { %p658_p11 = pneg %p657_p6  ;;  %p664_p10 = por %p663_p4, %p662_p9 }
  0x33   : > { %p665_p12 = pnand %p664_p10, %p658_p11 }
  0x35   : > { %668 = shalt.err (!%p665_p12)
}
  0x36   : > { %570 = dma.hbm_to_vmem [thread:$0]  (!%p966_p0), %s958_s10, 128, %s962_s12, %s198_s14  }
  0x37   : > { %p1189_p1 = scmp.lt.s32.totalorder %s845_s20, 3  ;;  %p1190_p2 = scmp.ge.s32.totalorder %s845_s20, 1 }
  0x38   : > { %s1011_s11 = scalar_lea.hbm %s1175_s1, %s545_s7  ;;  %s220_s26 = scalar_lea.vmem [#allocation5], %s544_s6 }
  0x39   : > { %p1002_p7 = pnand %p1190_p2, %p1189_p1  ;;  %s228_s8 = sshll.u32 %s220_s26, 4  ;;  %s229_s8 = int_to_ptr.vmem [resolvable:$true] %s228_s8 }
  0x3a   : > { %s217_s10 = scalar_lea.sflag [#allocation6], %s949_s5  ;;  %s669_s12 = scalar_lea.hbm %s1011_s11, 128 }
  0x3b   : > { %s1191_s24 = scalar_select %p1002_p7, 1, 0 }
  0x3c   : > { %p670_p9 = scmp.ne.s32.totalorder %s1011_s11, %s669_s12  ;;  %s674_s7 = scalar_lea.hbm %s1175_s1, 256 }
  0x3d   : > { %p675_p3 = scmp.lt.u32.totalorder %s1011_s11, %s1175_s1  ;;  %p676_p6 = scmp.lt.u32.totalorder %s674_s7, %s669_s12 }
  0x3e   : > { %p672_p11 = pnand %p670_p9, %p641_p5  ;;  %p678_p10 = scmp.lt.u32.totalorder %s669_s12, %s1011_s11 }
  0x3f   : > { %p677_p4 = por %p676_p6, %p675_p3 }
  0x40   : > { %p673_p13 = pneg %p672_p11 }
  0x41   : > { %p679_p12 = por %p678_p10, %p677_p4 }
  0x43   : > { %p680_p1 = pnand %p679_p12, %p673_p13 }
  0x45   : > { %683 = shalt.err (!%p680_p1)
}
  0x46   : > { %s684_s5 = scalar_lea.vmem %s229_s8, 128  ;;  %s848_s6 = smov [#allocation5]  }
  0x47   : > { %p685_p2 = scmp.ne.s32.totalorder %s229_s8, %s684_s5  ;;  %s689_s26 = sshll.u32 %s848_s6, 4  ;;  %s690_s26 = int_to_ptr.vmem [resolvable:$false] %s689_s26 }
  0x48   : > { %s691_s14 = scalar_lea.vmem %s690_s26, 256  ;;  %p692_p8 = scmp.lt.s32.totalorder %s229_s8, %s690_s26 }
  0x49   : > { %p687_p9 = pnand %p685_p2, %p641_p5  ;;  %p693_p7 = scmp.lt.s32.totalorder %s691_s14, %s684_s5 }
  0x4b   : > { %p688_p11 = pneg %p687_p9  ;;  %p694_p3 = por %p693_p7, %p692_p8 }
  0x4d   : > { %p695_p6 = pnand %p694_p3, %p688_p11 }
  0x4f   : > { %698 = shalt.err (!%p695_p6)
}
  0x50   : > { %573 = dma.hbm_to_vmem [thread:$0]  (!%p966_p0), %s1011_s11, 128, %s229_s8, %s217_s10  }
  0x51   : > { %p1192_p13 = scmp.ne.s32.totalorder %s1191_s24, 0 }
  0x52   : > { %s1038_s12 = sand.u32 (!%p1192_p13), 1, %s829_s16   ;;  %p1193_p5 = scmp.ne.s32.totalorder (!%p1192_p13), %s1184_s27, 0 }
  0x53   : > { %237 = sbr.rel (%p1192_p13) target bundleno = 202 (0xca), region = 28  ;;  %s549_s9 = sshll.u32 (!%p1192_p13), %s1038_s12, 3 }
  0x54   : > { %s240_s7 = scalar_lea.sflag (!%p1192_p13), [#allocation3], %s1038_s12  ;;  %s243_s22 = scalar_lea.vmem (!%p1192_p13), [#allocation2], %s549_s9 }
  0x5a   : > { %808 = dma.done.wait (%p1193_p5), %s240_s7, 128  }
  0x5b   : > { %810 = vsyncadd (%p1193_p5), %s240_s7, 4294967168  ;;  %s249_s13 = scalar_lea.sflag [#allocation6], %s1038_s12  ;;  %s252_s11 = scalar_lea.vmem [#allocation5], %s549_s9 }
  0x5c   : > { %812 = dma.done.wait (%p1193_p5), %s249_s13, 128  }
  0x5d   : > { %814 = vsyncadd (%p1193_p5), %s249_s13, 4294967168  ;;  %v289_v0 = vld [vmem:[%s243_s22] sm:$0xff]  ;;  %v290_v1 = vld [vmem:[%s252_s11] sm:$0xff]  ;;  %v849_v3 = vmov 0.0   ;;  %s288_s24 = scalar_lea.vmem [#allocation10], %s1038_s12  ;;  %s282_s27 = scalar_lea.vmem [#allocation8], %s1038_s12 }
  0x5e   : > { %v293_v2 = vand.u32 2147483647, %v289_v0  ;;  %vm311_vm0 = vcmp.gt.f32.partialorder %v290_v1, 0.5  ;;  %v291_v17 = vsub.f32 0.0, %v289_v0  ;;  %v307_v19 = vsub.f32 1.0, %v290_v1  ;;  %s371_s8 = sshll.u32 %s282_s27, 4  ;;  %s1058_s8 = int_to_ptr.vmem [resolvable:$true] %s371_s8 }
  0x5f   : > { %v551_v4 = vsel %vm311_vm0, 1.0, %v849_v3  ;;  %s276_s10 = scalar_lea.vmem [#allocation7], %s1038_s12  ;;  %s339_s5 = sand.u32 1, %s909_s21  }
  0x60   : > { %v294_v5 = vsub.f32 0.0, %v293_v2  ;;  %v328_v6 = vrot.slane %v551_v4, 4  ;;  %v292_v22 = vmax.f32 %v291_v17, 0.0  ;;  %v308_v24 = vmul.f32 %v307_v19, %v289_v0  ;;  %s357_s25 = sshll.u32 %s276_s10, 4  ;;  %s552_s6 = sshll.u32 %s837_s18, 4  ;;  %s1060_s25 = int_to_ptr.vmem [resolvable:$true] %s357_s25 }
  0x61   : > { %s385_s26 = sshll.u32 %s288_s24, 4  ;;  %s1067_s7 = scalar_lea.hbm %s1177_s3, %s552_s6  ;;  %s1074_s26 = int_to_ptr.vmem [resolvable:$true] %s385_s26 }
  0x62   : > { %v295_v7 = vmul.f32 1.442695, %v294_v5  ;;  %v329_v8 = vadd.f32 %v551_v4, %v328_v6  ;;  %s1072_s22 = scalar_lea.hbm %s1176_s2, %s552_s6  ;;  %s1081_s0 = scalar_lea.sflag [#allocation9], %s339_s5 }
  0x63   : > { %s699_s14 = scalar_lea.vmem %s1058_s8, 16  ;;  %p1194_p0 = scmp.ne.s32.totalorder %s1185_s28, 0 }
  0x64   : > { %635 = vpow2.f32 %v295_v7  ;;  %v330_v9 = vrot.slane %v329_v8, 2  ;;  %p700_p8 = scmp.ne.s32.totalorder %s1058_s8, %s699_s14  ;;  %s850_s9 = smov [#allocation8]  }
  0x65   : > { %s703_s18 = sshll.u32 %s850_s9, 4  ;;  %s704_s18 = int_to_ptr.vmem [resolvable:$false] %s703_s18 }
  0x66   : > { %v331_v10 = vadd.f32 %v330_v9, %v329_v8  ;;  %p701_p7 = pnand %p700_p8, %p1194_p0  ;;  %s705_s21 = scalar_lea.vmem %s704_s18, 32 }
  0x67   : > { %p706_p10 = scmp.lt.s32.totalorder %s1058_s8, %s704_s18  ;;  %p707_p12 = scmp.lt.s32.totalorder %s705_s21, %s699_s14 }
  0x68   : > { %v332_v11 = vrot.slane %v331_v10, 1  ;;  %p702_p4 = pneg %p701_p7 }
  0x69   : > { %p708_p1 = por %p707_p12, %p706_p10 }
  0x6a   : > { %v333_v12 = vadd.f32 %v332_v11, %v331_v10 }
  0x6b   : > { %p709_p2 = pnand %p708_p1, %p702_p4 }
  0x6c   : > { %334 = vst [vmem:[%s288_s24] sm:$0x1] %v333_v12  ;;  %s1079_s24 = scalar_lea.hbm %s1178_s4, %s552_s6 }
  0x6e   : > { %v636_v13 = vpop.eup %635 }
  0x6f   : > { %v297_v14 = vadd.f32 1.0, %v636_v13  ;;  %v300_v15 = vmul.f32 -0.5, %v636_v13  ;;  %v303_v18 = vand.u32 2147483647, %v636_v13 }
  0x71   : > { %637 = vlog2.f32 %v297_v14  ;;  %v301_v16 = vadd.f32 1.0, %v300_v15  ;;  %vm304_vm1 = vcmp.lt.f32.partialorder %v303_v18, 0.0004427343 }
  0x73   : > { %v302_v20 = vmul.f32 %v636_v13, %v301_v16 }
  0x7b   : > { %v638_v21 = vpop.eup %637 }
  0x7c   : > { %v299_v23 = vmul.f32 0.6931472, %v638_v21 }
  0x7e   : > { %v305_v25 = vsel %vm304_vm1, %v302_v20, %v299_v23 }
  0x7f   : > { %v306_v26 = vadd.f32 %v305_v25, %v292_v22 }
  0x81   : > { %v310_v27 = vmul.f32 %v306_v26, %v290_v1  ;;  %v309_v28 = vadd.f32 %v308_v24, %v306_v26 }
  0x83   : > { %v321_v29 = vrot.slane %v310_v27, 4  ;;  %v314_v30 = vrot.slane %v309_v28, 4 }
  0x85   : > { %v322_v31 = vadd.f32 %v321_v29, %v310_v27  ;;  %v315_v32 = vadd.f32 %v314_v30, %v309_v28 }
  0x87   : > { %v323_v33 = vrot.slane %v322_v31, 2  ;;  %v316_v34 = vrot.slane %v315_v32, 2 }
  0x89   : > { %v324_v35 = vadd.f32 %v323_v33, %v322_v31  ;;  %v317_v36 = vadd.f32 %v316_v34, %v315_v32 }
  0x8b   : > { %v325_v37 = vrot.slane %v324_v35, 1  ;;  %v318_v38 = vrot.slane %v317_v36, 1 }
  0x8d   : > { %v326_v39 = vadd.f32 %v325_v37, %v324_v35  ;;  %v319_v40 = vadd.f32 %v318_v38, %v317_v36 }
  0x8f   : > { %327 = vst [vmem:[%s282_s27] sm:$0x1] %v326_v39  ;;  %320 = vst [vmem:[%s276_s10] sm:$0x1] %v319_v40 }
  0x90   : > { %712 = shalt.err (!%p709_p2)
}
  0x91   : > { %s713_s27 = scalar_lea.hbm %s1067_s7, 16  ;;  %s717_s6 = scalar_lea.hbm %s1177_s3, 32 }
  0x92   : > { %p714_p9 = scmp.ne.s32.totalorder %s1067_s7, %s713_s27  ;;  %p718_p6 = scmp.lt.u32.totalorder %s1067_s7, %s1177_s3 }
  0x93   : > { %p719_p13 = scmp.lt.u32.totalorder %s717_s6, %s713_s27  ;;  %p721_p8 = scmp.lt.u32.totalorder %s713_s27, %s1067_s7 }
  0x94   : > { %p715_p11 = pnand %p714_p9, %p1194_p0 }
  0x95   : > { %p720_p5 = por %p719_p13, %p718_p6 }
  0x96   : > { %p716_p3 = pneg %p715_p11 }
  0x97   : > { %p722_p7 = por %p721_p8, %p720_p5 }
  0x99   : > { %p723_p4 = pnand %p722_p7, %p716_p3 }
  0x9b   : > { %726 = shalt.err (!%p723_p4)
}
  0x9c   : > { %562 = dma.vmem_to_hbm [thread:$0]  (%p1194_p0), %s1058_s8, 16, %s1067_s7, %s1081_s0  }
  0x9d   : > { %s336_s14 = scalar_lea.sflag [#allocation4], %s1038_s12  ;;  %s727_s9 = scalar_lea.vmem %s1060_s25, 16 }
  0x9e   : > { %p728_p10 = scmp.ne.s32.totalorder %s1060_s25, %s727_s9  ;;  %s851_s18 = smov [#allocation7]  }
  0x9f   : > { %s731_s21 = sshll.u32 %s851_s18, 4  ;;  %s732_s21 = int_to_ptr.vmem [resolvable:$false] %s731_s21 }
  0xa0   : > { %p729_p12 = pnand %p728_p10, %p1194_p0  ;;  %s733_s27 = scalar_lea.vmem %s732_s21, 32 }
  0xa1   : > { %p734_p2 = scmp.lt.s32.totalorder %s1060_s25, %s732_s21  ;;  %p735_p9 = scmp.lt.s32.totalorder %s733_s27, %s727_s9 }
  0xa2   : > { %p730_p1 = pneg %p729_p12 }
  0xa3   : > { %p736_p11 = por %p735_p9, %p734_p2 }
  0xa5   : > { %p737_p3 = pnand %p736_p11, %p730_p1 }
  0xa7   : > { %740 = shalt.err (!%p737_p3)
}
  0xa8   : > { %s741_s12 = scalar_lea.hbm %s1072_s22, 16  ;;  %s745_s10 = scalar_lea.hbm %s1176_s2, 32 }
  0xa9   : > { %p742_p6 = scmp.ne.s32.totalorder %s1072_s22, %s741_s12  ;;  %p746_p8 = scmp.lt.u32.totalorder %s1072_s22, %s1176_s2 }
  0xaa   : > { %p747_p7 = scmp.lt.u32.totalorder %s745_s10, %s741_s12  ;;  %p749_p10 = scmp.lt.u32.totalorder %s741_s12, %s1072_s22 }
  0xab   : > { %p743_p13 = pnand %p742_p6, %p1194_p0 }
  0xac   : > { %p748_p4 = por %p747_p7, %p746_p8 }
  0xad   : > { %p744_p5 = pneg %p743_p13 }
  0xae   : > { %p750_p12 = por %p749_p10, %p748_p4 }
  0xb0   : > { %p751_p1 = pnand %p750_p12, %p744_p5 }
  0xb2   : > { %754 = shalt.err (!%p751_p1)
}
  0xb3   : > { %561 = dma.vmem_to_hbm [thread:$0]  (%p1194_p0), %s1060_s25, 16, %s1072_s22, %s336_s14  }
  0xb4   : > { %s755_s13 = scalar_lea.vmem %s1074_s26, 16  ;;  %s852_s11 = smov [#allocation10]  }
  0xb5   : > { %p756_p2 = scmp.ne.s32.totalorder %s1074_s26, %s755_s13  ;;  %s759_s9 = sshll.u32 %s852_s11, 4  ;;  %s760_s9 = int_to_ptr.vmem [resolvable:$false] %s759_s9 }
  0xb6   : > { %s761_s18 = scalar_lea.vmem %s760_s9, 32  ;;  %p762_p3 = scmp.lt.s32.totalorder %s1074_s26, %s760_s9 }
  0xb7   : > { %p757_p9 = pnand %p756_p2, %p1194_p0  ;;  %p763_p6 = scmp.lt.s32.totalorder %s761_s18, %s755_s13 }
  0xb9   : > { %p758_p11 = pneg %p757_p9  ;;  %p764_p13 = por %p763_p6, %p762_p3 }
  0xbb   : > { %p765_p5 = pnand %p764_p13, %p758_p11 }
  0xbd   : > { %768 = shalt.err (!%p765_p5)
}
  0xbe   : > { %s769_s25 = scalar_lea.hbm %s1079_s24, 16  ;;  %s773_s21 = scalar_lea.hbm %s1178_s4, 32 }
  0xbf   : > { %p770_p8 = scmp.ne.s32.totalorder %s1079_s24, %s769_s25  ;;  %p774_p10 = scmp.lt.u32.totalorder %s1079_s24, %s1178_s4 }
  0xc0   : > { %p775_p12 = scmp.lt.u32.totalorder %s773_s21, %s769_s25  ;;  %p777_p2 = scmp.lt.u32.totalorder %s769_s25, %s1079_s24 }
  0xc1   : > { %p771_p7 = pnand %p770_p8, %p1194_p0 }
  0xc2   : > { %p776_p1 = por %p775_p12, %p774_p10 }
  0xc3   : > { %p772_p4 = pneg %p771_p7 }
  0xc4   : > { %p778_p9 = por %p777_p2, %p776_p1 }
  0xc6   : > { %p779_p11 = pnand %p778_p9, %p772_p4 }
  0xc8   : > { %782 = shalt.err (!%p779_p11)
}
  0xc9   : > { %563 = dma.vmem_to_hbm [thread:$0]  (%p1194_p0), %s1074_s26, 16, %s1079_s24, %s1081_s0  }
  0xca PF: > { %s397_s8 = sand.u32 1, %s825_s15   ;;  %p1195_p3 = scmp.ne.s32.totalorder %s1186_s30, 0 }
  0xcb   : > { %p1196_p6 = scmp.ge.s32.totalorder %s845_s20, 2  ;;  %s398_s7 = scalar_lea.sflag [#allocation4], %s397_s8 }
  0xcd   : > { %p575_p13 = pnand %p1196_p6, %p1195_p3 }
  0xcf   : > { %816 = dma.done.wait (!%p575_p13), %s398_s7, 16  }
  0xd0   : > { %818 = vsyncadd (!%p575_p13), %s398_s7, 4294967280  ;;  %s1197_s10 = sadd.s32 4294967294, %s845_s20  }
  0xd1   : > { %s405_s5 = sand.u32 1, %s1197_s10  }
  0xd2   : > { %s406_s6 = scalar_lea.sflag [#allocation9], %s405_s5 }
  0xd3   : > { %820 = dma.done.wait (!%p575_p13), %s406_s6, 32  }
  0xd4   : > { %822 = vsyncadd (!%p575_p13), %s406_s6, 4294967264  ;;  %s27_s20 = sadd.s32 1, %s845_s20   ;;  %s1198_s15 = smov %s829_s16 }
  0xd5   : > { %p24_p0 = scmp.ge.s32.totalorder %s27_s20, 4   ;;  %s1199_s16 = smov %s833_s17 }
  0xd6   : > { %s1200_s17 = smov %s940_s29  ;;  %s1201_s18 = smov %s841_s19 }
  0xd7   : > { %s1202_s19 = smov %s1204_s23  ;;  %26 = sbr.rel (!%p24_p0) target bundleno = 12 (0xc), region = 118 }
  0xde   :  { %418 = vsyncpa [#allocation3], 1 }
  0xdf   :  { %420 = vsyncpa [#allocation3 + $0x1], 1 }
  0xe0   :  { %421 = vsyncpa [#allocation6], 1 }
  0xe1   :  { %423 = vsyncpa [#allocation6 + $0x1], 1 }
  0xe2   :  { %424 = vsyncpa [#allocation4], 1 }
  0xe3   :  { %426 = vsyncpa [#allocation4 + $0x1], 1 }
  0xe4   :  { %427 = vsyncpa [#allocation9], 1 }
  0xe5   :  { %429 = vsyncpa [#allocation9 + $0x1], 1 }

</bundles_post_ra>
